<compile_context>
chip_gen: v6e
topology: v6e:2x2x1
jax: 0.10.0
libtpu: 0.0.40
codegen_flags: <defaults>
</compile_context>

<pallas_src>
import jax
import jax.numpy as jnp
from jax.experimental import pallas as pl
from jax.experimental.pallas import tpu as pltpu


def gate_kernel(x_ref, w1_ref, b1_ref, w2_ref, b2_ref, o_ref):
    # x_ref:(TM,E) w1_ref:(E,Hp) b1_ref:(1,Hp) w2_ref:(1,Hp) b2_ref:(1,1) SMEM
    # o_ref:(1,TM) -- lane-dense row vector of gates for this row tile.
    h = jnp.dot(x_ref[...], w1_ref[...], preferred_element_type=jnp.float32)
    h = jnp.tanh(h + b1_ref[...].astype(jnp.float32))            # (TM, Hp), f32
    # Second Linear has N=1: do it on the VPU/XLU instead of the MXU.
    g = jnp.sum(h * w2_ref[...].astype(jnp.float32), axis=-1)    # (TM,)
    g = g + b2_ref[0, 0].astype(jnp.float32)
    o_ref[...] = g[None, :].astype(o_ref.dtype)                  # (1, TM) lane-dense store


def _round_up(x: int, m: int) -> int:
    return (x + m - 1) // m * m


def gate_layer(seqs, w1, b1, w2, b2, *, tm=512):
    """seqs: [B, S, E] -> gates: [B, S, 1] (f32), matching GateLayer.forward."""
    B, S, E = seqs.shape
    H = w1.shape[1]
    M = B * S

    # Big row tiles amortize grid-step overhead; shrink (16-aligned) for tiny inputs.
    tm = min(tm, _round_up(M, 16))
    M_pad = _round_up(M, tm)
    n_tiles = M_pad // tm

    # Pad hidden dim to a lane-dense multiple of 128 (zero pads contribute 0 to the gate).
    Hp = _round_up(H, 128)

    x = seqs.reshape(M, E)
    if M_pad != M:
        x = jnp.pad(x, ((0, M_pad - M), (0, 0)))
    w1_p = jnp.pad(w1, ((0, 0), (0, Hp - H)))
    b1_p = jnp.pad(b1.reshape(1, H).astype(jnp.float32), ((0, 0), (0, Hp - H)))
    w2_p = jnp.pad(w2.reshape(1, H).astype(jnp.float32), ((0, 0), (0, Hp - H)))
    b2_p = b2.reshape(1, 1).astype(jnp.float32)

    cost = pl.CostEstimate(
        flops=int(2 * M_pad * E * Hp + 2 * M_pad * Hp),
        transcendentals=int(M_pad * Hp),
        bytes_accessed=int(
            x.size * x.dtype.itemsize
            + w1_p.size * w1_p.dtype.itemsize
            + (b1_p.size + w2_p.size + b2_p.size + M_pad) * 4
        ),
    )

    out = pl.pallas_call(
        gate_kernel,
        out_shape=jax.ShapeDtypeStruct((n_tiles, tm), jnp.float32),
        grid_spec=pl.GridSpec(
            grid=(n_tiles,),
            in_specs=[
                pl.BlockSpec((tm, E), lambda i: (i, 0)),   # x, streamed over row tiles
                # Weights/biases: constant index maps -> resident across the grid.
                # NOTE: for large E*Hp, pipeline_mode=pl.Buffered(1) on these would
                # drop the default 2x double-buffer reservation for invariant operands.
                pl.BlockSpec((E, Hp), lambda i: (0, 0)),   # W1
                pl.BlockSpec((1, Hp), lambda i: (0, 0)),   # b1 (row)
                pl.BlockSpec((1, Hp), lambda i: (0, 0)),   # W2 as a row vector
                pl.BlockSpec(memory_space=pltpu.MemorySpace.SMEM),  # b2 scalar
            ],
            out_specs=pl.BlockSpec((1, tm), lambda i: (i, 0)),      # lane-dense slab
        ),
        compiler_params=pltpu.CompilerParams(
            dimension_semantics=("parallel",),      # megacore / v7x dual-TC sharding
            vmem_limit_bytes=32 * 1024 * 1024,      # explicit; fits v5e/v6e/v7x budgets
        ),
        cost_estimate=cost,
    )(x, w1_p, b1_p, w2_p, b2_p)

    return out.reshape(M_pad)[:M].reshape(B, S, 1)


def init_params(key, embedding_size, hidden_size, dtype=jnp.float32):
    """Deterministic synthetic init (PyTorch-Linear-like uniform bounds)."""
    k1, k2, k3, k4 = jax.random.split(key, 4)
    lim1 = 1.0 / jnp.sqrt(embedding_size)
    lim2 = 1.0 / jnp.sqrt(hidden_size)
    w1 = jax.random.uniform(k1, (embedding_size, hidden_size), dtype, -lim1, lim1)
    b1 = jax.random.uniform(k2, (hidden_size,), dtype, -lim1, lim1)
    w2 = jax.random.uniform(k3, (hidden_size, 1), dtype, -lim2, lim2)
    b2 = jax.random.uniform(k4, (1,), dtype, -lim2, lim2)
    return w1, b1, w2, b2


if __name__ == "__main__":
    B, S, E, H = 2, 8, 32, 32
    key = jax.random.PRNGKey(0)
    k_x, k_p = jax.random.split(key)
    seqs = jax.random.normal(k_x, (B, S, E), jnp.float32)
    w1, b1, w2, b2 = init_params(k_p, E, H)

    # Pure-JAX reference.
    ref = jnp.tanh(seqs @ w1 + b1) @ w2 + b2

    # f32 path (exact check).
    gates = gate_layer(seqs, w1, b1, w2, b2)
    gates = jax.block_until_ready(gates)
    assert gates.shape == (B, S, 1)
    assert jnp.allclose(gates, ref, atol=1e-5, rtol=1e-5)

    # bf16 activations/W1 path (v6e/v7x: halves HBM traffic of the dominant x stream).
    gates_bf16 = gate_layer(
        seqs.astype(jnp.bfloat16), w1.astype(jnp.bfloat16), b1, w2, b2
    )
    gates_bf16 = jax.block_until_ready(gates_bf16)
    assert gates_bf16.shape == (B, S, 1)
    assert jnp.allclose(gates_bf16, ref, atol=5e-2, rtol=5e-2)

    print("KERNEL_OK")
</pallas_src>

<mosaic_0001>
module attributes {stable_mosaic.version = 11 : i64} {
  func.func @gate_kernel(%arg0: i32, %arg1: memref<16x32xf32, #tpu.memory_space<vmem>>, %arg2: memref<32x128xf32, #tpu.memory_space<vmem>>, %arg3: memref<1x128xf32, #tpu.memory_space<vmem>>, %arg4: memref<1x128xf32, #tpu.memory_space<vmem>>, %arg5: memref<1x1xf32, #tpu.memory_space<smem>>, %arg6: memref<1x16xf32, #tpu.memory_space<vmem>>) attributes {dimension_semantics = [#tpu.dimension_semantics<parallel>], iteration_bounds = array<i64: 1>, scalar_prefetch = 0 : i64, scratch_operands = 0 : i64, tpu.core_type = #tpu.core_type<tc>, window_params = [{transform_indices = @transform_0, window_bounds = array<i64: 16, 32>}, {pipeline_mode = #tpu.pipeline_mode<synchronous>, transform_indices = @transform_1, window_bounds = array<i64: 32, 128>}, {pipeline_mode = #tpu.pipeline_mode<synchronous>, transform_indices = @transform_2, window_bounds = array<i64: 1, 128>}, {pipeline_mode = #tpu.pipeline_mode<synchronous>, transform_indices = @transform_3, window_bounds = array<i64: 1, 128>}, {transform_indices = @transform_4, window_bounds = array<i64: 1, 1>}, {transform_indices = @transform_5, window_bounds = array<i64: 1, 16>}]} {
    %c0 = arith.constant 0 : index
    %c0_0 = arith.constant 0 : index
    %0 = vector.load %arg1[%c0, %c0_0] : memref<16x32xf32, #tpu.memory_space<vmem>>, vector<16x32xf32>
    %c0_1 = arith.constant 0 : index
    %c0_2 = arith.constant 0 : index
    %1 = vector.load %arg2[%c0_1, %c0_2] : memref<32x128xf32, #tpu.memory_space<vmem>>, vector<32x128xf32>
    %cst = arith.constant dense<0.000000e+00> : vector<16x128xf32>
    %2 = tpu.matmul %0, %1, %cst {dimension_numbers = #tpu.dot_dimension_numbers<[1], [0], [0], [1], [0, 0, 1, 1], [], []>} : vector<16x32xf32>, vector<32x128xf32>, vector<16x128xf32> -> vector<16x128xf32>
    %c0_3 = arith.constant 0 : index
    %c0_4 = arith.constant 0 : index
    %3 = vector.load %arg3[%c0_3, %c0_4] : memref<1x128xf32, #tpu.memory_space<vmem>>, vector<1x128xf32>
    %4 = vector.broadcast %3 : vector<1x128xf32> to vector<16x128xf32>
    %5 = arith.addf %2, %4 : vector<16x128xf32>
    %6 = math.tanh %5 : vector<16x128xf32>
    %c0_5 = arith.constant 0 : index
    %c0_6 = arith.constant 0 : index
    %7 = vector.load %arg4[%c0_5, %c0_6] : memref<1x128xf32, #tpu.memory_space<vmem>>, vector<1x128xf32>
    %8 = vector.broadcast %7 : vector<1x128xf32> to vector<16x128xf32>
    %9 = arith.mulf %6, %8 : vector<16x128xf32>
    %cst_7 = arith.constant dense<0.000000e+00> : vector<16xf32>
    %10 = vector.multi_reduction <add>, %9, %cst_7 [1] : vector<16x128xf32> to vector<16xf32>
    %c0_8 = arith.constant 0 : index
    %c0_9 = arith.constant 0 : index
    %11 = memref.load %arg5[%c0_8, %c0_9] : memref<1x1xf32, #tpu.memory_space<smem>>
    %12 = vector.broadcast %11 : f32 to vector<16xf32>
    %13 = arith.addf %10, %12 : vector<16xf32>
    %14 = vector.shape_cast %13 : vector<16xf32> to vector<1x16xf32>
    %c0_10 = arith.constant 0 : index
    %c0_11 = arith.constant 0 : index
    %15 = vector.load %arg6[%c0_10, %c0_11] : memref<1x16xf32, #tpu.memory_space<vmem>>, vector<1x16xf32>
    tpu.vector_store %arg6[%c0_10, %c0_11], %14 {strides = array<i32>} : memref<1x16xf32, #tpu.memory_space<vmem>>, vector<1x16xf32>,
    return
  }
  func.func @transform_0(%arg0: i32) -> (i32, i32) {
    %c0_i32 = arith.constant 0 : i32
    %c0_i32_0 = arith.constant 0 : i32
    return %arg0, %c0_i32 : i32, i32
  }
  func.func @transform_1(%arg0: i32) -> (i32, i32) {
    %c0_i32 = arith.constant 0 : i32
    %c0_i32_0 = arith.constant 0 : i32
    %c0_i32_1 = arith.constant 0 : i32
    return %c0_i32, %c0_i32_0 : i32, i32
  }
  func.func @transform_2(%arg0: i32) -> (i32, i32) {
    %c0_i32 = arith.constant 0 : i32
    %c0_i32_0 = arith.constant 0 : i32
    %c0_i32_1 = arith.constant 0 : i32
    return %c0_i32, %c0_i32_0 : i32, i32
  }
  func.func @transform_3(%arg0: i32) -> (i32, i32) {
    %c0_i32 = arith.constant 0 : i32
    %c0_i32_0 = arith.constant 0 : i32
    %c0_i32_1 = arith.constant 0 : i32
    return %c0_i32, %c0_i32_0 : i32, i32
  }
  func.func @transform_4(%arg0: i32) -> (i32, i32) {
    %c0_i32 = arith.constant 0 : i32
    %c0_i32_0 = arith.constant 0 : i32
    %c0_i32_1 = arith.constant 0 : i32
    return %c0_i32, %c0_i32_0 : i32, i32
  }
  func.func @transform_5(%arg0: i32) -> (i32, i32) {
    %c0_i32 = arith.constant 0 : i32
    %c0_i32_0 = arith.constant 0 : i32
    return %arg0, %c0_i32 : i32, i32
  }
}

</mosaic_0001>

<bundles_post_ra>
// kernel: tpu_custom_call.1
= control target key start
LH: loop header
LB: loop body
LE: loop exit
PB: predicated region body
PF: predicated region fallthrough
CT: control target
= control target key end

     0   :  { %11 = vsyncpa [#allocation4], 0  ;;  %s349_s0 = inlined_call_operand.hbm [shape: f32[16,32], index: 0, kind: input, shape index: {}]   ;;  %s350_s1 = inlined_call_operand.hbm [shape: f32[32,128], index: 1, kind: input, shape index: {}]   ;;  %s351_s2 = inlined_call_operand.vmem [shape: f32[1,128], index: 2, kind: input, shape index: {}]   ;;  %s352_s3 = inlined_call_operand.vmem [shape: f32[1,128], index: 3, kind: input, shape index: {}]   ;;  %s353_s4 = inlined_call_operand.<no memory space> [shape: f32[1,1], index: 4, kind: input, shape index: {}]   ;;  %s354_s5 = inlined_call_operand.hbm [shape: f32[1,16], index: 5, kind: output, shape index: {}]  }
   0x1   :  { %12 = vsyncpa [#allocation7], 0 }
   0x2   :  { %13 = vsyncpa [#allocation5], 0  ;;  %s294_s18 = smov [#allocation3]  }
   0x3   :  { %s19_s19 = sshll.u32 %s294_s18, 4  ;;  %s20_s19 = int_to_ptr.vmem [resolvable:$true] %s19_s19 }
   0x4   :  { %s236_s20 = scalar_lea.vmem %s20_s19, 256  ;;  %p241_p1 = scmp.lt.s32.totalorder %s20_s19, %s20_s19 }
   0x5   :  { %p237_p0 = scmp.ne.s32.totalorder %s20_s19, %s236_s20  ;;  %p242_p2 = scmp.lt.s32.totalorder %s236_s20, %s236_s20 }
   0x7   :  { %p243_p3 = por %p242_p2, %p241_p1 }
   0x9   :  { %p244_p4 = pnand %p243_p3, %p237_p0 }
   0xb   :  { %247 = shalt.err (!%p244_p4)
}
   0xc   :  { %s295_s21 = smov 128   ;;  %s296_s22 = smov 8  }
   0xd   :  { %25 = dma.hbm_to_vmem [thread:$0]  %s349_s0, 256, %s20_s19, [#allocation4], %s295_s21, %s295_s21, %s296_s22  }
   0xe   :  { %s297_s25 = smov [#allocation6]  }
   0xf   :  { %s31_s26 = sshll.u32 %s297_s25, 4  ;;  %s32_s26 = int_to_ptr.vmem [resolvable:$true] %s31_s26 }
  0x10   :  { %s256_s27 = scalar_lea.vmem %s32_s26, 512  ;;  %p261_p6 = scmp.lt.s32.totalorder %s32_s26, %s32_s26 }
  0x11   :  { %p257_p5 = scmp.ne.s32.totalorder %s32_s26, %s256_s27  ;;  %p262_p7 = scmp.lt.s32.totalorder %s256_s27, %s256_s27 }
  0x13   :  { %p263_p8 = por %p262_p7, %p261_p6 }
  0x15   :  { %p264_p9 = pnand %p263_p8, %p257_p5 }
  0x17   :  { %267 = shalt.err (!%p264_p9)
}
  0x18   :  { %37 = dma.hbm_to_vmem [thread:$0]  %s350_s1, 512, %s32_s26, [#allocation7], %s295_s21, %s295_s21, %s296_s22  }
  0x19   :  { %288 = dma.done.wait [#allocation4], 256  }
  0x1a   :  { %289 = vsyncadd [#allocation4], 4294967040 }
  0x1b   :  { %290 = dma.done.wait [#allocation7], 512  }
  0x1c   :  { %291 = vsyncadd [#allocation7], 4294966784  ;;  %vm63_vm0 = vcmask 261120   ;;  %v55_v0 = vld [vmem:[#allocation6 + $0x18] sm:$0xff]  ;;  %v54_v1 = vld [vmem:[#allocation6 + $0x10] sm:$0xff]  ;;  %v166_v16 = vlaneseq  ;;  %v161_v20 = vstv %s353_s4  ;;  %vm177_vm1 = vcmask 130112  }
  0x1d   :  { %208 = vmatprep.subr.mxu0 %v55_v0  ;;  %v50_v2 = vld [vmem:[#allocation3] sm:$0xff]  ;;  %v53_v3 = vld [vmem:[#allocation6 + $0x8] sm:$0xff]  ;;  %v52_v4 = vld [vmem:[#allocation6] sm:$0xff]  ;;  %vm180_vm2 = vcmask 122880  }
  0x1e   :  { %209 = vmatpush3.msra.mxu0 %v55_v0  ;;  %216 = vmatprep.mubr.msk.f32.mxu0 %vm63_vm0, %v50_v2  ;;  %v51_v5 = vld [vmem:[#allocation3 + $0x8] sm:$0xff]  ;;  %v198_v7 = vld [vmem:[%s351_s2] ss:$0 sm:$0xff]  ;;  %v167_v17 = vand.u32 127, %v166_v16  ;;  %v169_v18 = vshrl.u32 %v166_v16, 7 }
  0x1f   :  { %210 = vmatprep.subr.mxu0 %v54_v1  ;;  %v201_v12 = vld [vmem:[%s352_s3] ss:$0 sm:$0xff]  ;;  %s298_s3 = smov [#allocation8]  }
  0x20   :  { %211 = vmatpush3.msra.mxu0 %v54_v1  ;;  %v172_v19 = vadd.s32 4294967288, %v167_v17  ;;  %v170_v22 = vsub.s32 %v167_v17, %v169_v18  ;;  %s188_s8 = sshll.u32 %s298_s3, 4  ;;  %s189_s8 = int_to_ptr.vmem [resolvable:$true] %s188_s8 }
  0x21   :  { %212 = vmatprep.subr.mxu0 %v53_v3  ;;  %s268_s9 = scalar_lea.vmem %s189_s8, 16  ;;  %s272_s10 = scalar_lea.vmem %s189_s8, 32 }
  0x22   :  { %213 = vmatpush3.msra.mxu0 %v53_v3  ;;  %v175_v24 = vsub.s32 %v172_v19, %v169_v18  ;;  %p269_p10 = scmp.ne.s32.totalorder %s189_s8, %s268_s9  ;;  %p273_p11 = scmp.lt.s32.totalorder %s189_s8, %s189_s8 }
  0x23   :  { %214 = vmatprep.subr.mxu0 %v52_v4  ;;  %p274_p12 = scmp.lt.s32.totalorder %s272_s10, %s268_s9 }
  0x24   :  { %215 = vmatpush3.msra.mxu0 %v52_v4 }
  0x25   :  { %217 = vmatmul.mubr.msk.f32.vlgmr.msra.gmra.mxu0 %vm63_vm0, %v51_v5  ;;  %p275_p13 = por %p274_p12, %p273_p11 }
  0x27   :  { %p276_p0 = pnand %p275_p13, %p269_p10 }
  0xe5   :  { %v218_v6 = vpop.f32.mrf.mxu0 }
  0xe6   :  { %v142_v9 = vadd.f32 %v218_v6, %v198_v7 }
  0xe7   :  { %v136_v8 = vpop.f32.mrf.mxu0 }
  0xe8   :  { %v137_v10 = vadd.f32 %v198_v7, %v136_v8 }
  0xea   :  { %224 = vtanh.f32 %v137_v10 }
  0xeb   :  { %226 = vtanh.f32 %v142_v9 }
  0xf7   :  { %v225_v11 = vpop.eup %224 }
  0xf8   :  { %v154_v13 = vmul.f32 %v225_v11, %v201_v12  ;;  %v227_v14 = vpop.eup %226 }
  0xf9   :  { %v155_v15 = vmul.f32 %v227_v14, %v201_v12 }
  0xfa   :  { %156 = vadd.xlane.f32.xlu0 %v154_v13 }
  0xfe   :  { %158 = vadd.xlane.f32.xlu0 %v155_v15 }
 0x183   :  { %v157_v21 = vpop.xlane.xlu0 %156 }
 0x184   :  { %v162_v23 = vadd.f32 %v161_v20, %v157_v21 }
 0x186   :  { %v171_v27 = vrot.slane %v162_v23, %v170_v22 }
 0x187   :  { %v159_v25 = vpop.xlane.xlu0 %158 }
 0x188   :  { %v163_v26 = vadd.f32 %v161_v20, %v159_v25 }
 0x18a   :  { %v176_v28 = vrot.slane %v163_v26, %v175_v24 }
 0x18c   :  { %v178_v29 = vsel %vm177_vm1, %v176_v28, %v171_v27 }
 0x18d   :  { %181 = vst.msk [vmem:[#allocation8] sm:$0x1] %vm180_vm2, %v178_v29 }
 0x18e   :  { %279 = shalt.err (!%p276_p0)
}
 0x18f   :  { %191 = dma.vmem_to_hbm [thread:$0]  %s189_s8, 16, %s354_s5, [#allocation5]  }
 0x190   :  { %292 = dma.done.wait [#allocation5], 16  }
 0x191   :  { %293 = vsyncadd [#allocation5], 4294967280 }
 0x192   :  { %195 = vsyncpa [#allocation4], 1 }
 0x193   :  { %196 = vsyncpa [#allocation7], 1 }
 0x194   :  { %197 = vsyncpa [#allocation5], 1 }

</bundles_post_ra>
